<compile_context>
chip_gen: v7x
topology: tpu7x:2x2x1
jax: 0.10.0
libtpu: 0.0.40
codegen_flags: <defaults>
</compile_context>

<pallas_src>
import functools
import math

import jax
import jax.numpy as jnp
from jax.experimental import pallas as pl
from jax.experimental.pallas import tpu as pltpu


# ----------------------------------------------------------------------------
# Per-generation VMEM budget and compiler params
# ----------------------------------------------------------------------------

def _vmem_limit_bytes():
    """Scoped-VMEM limit with headroom: ~38 MiB on v7x (64 MiB physical per
    TensorCore), 48 MiB on v5e/v6e (128 MiB physical)."""
    try:
        cap = pltpu.get_tpu_info().vmem_capacity_bytes
    except Exception:  # noqa: BLE001 - conservative fallback if query fails
        cap = 128 * 1024 * 1024
    if cap <= 64 * 1024 * 1024:
        return 38 * 1024 * 1024
    return 48 * 1024 * 1024


_VMEM_LIMIT_BYTES = _vmem_limit_bytes()


def _cp(n_parallel_axes=1):
    return pltpu.CompilerParams(
        dimension_semantics=("parallel",) * n_parallel_axes,
        vmem_limit_bytes=_VMEM_LIMIT_BYTES)


def _const_spec(shape):
    """BlockSpec for an operand with a constant index map (weights, biases,
    LN params): DMA'd once, so single-buffer it to save VMEM (key on v7x)."""
    return pl.BlockSpec(shape, lambda i: (0,) * len(shape),
                        pipeline_mode=pl.Buffered(1))


# ----------------------------------------------------------------------------
# Row tiling (big tiles, padded instead of falling back to one huge tile)
# ----------------------------------------------------------------------------

_ROW_TILE_TARGET = 512  # ~85% of HBM roofline at 512-row tiles vs ~63% at 256


def _round_up(x, m):
    return ((x + m - 1) // m) * m


def _row_tiling(M):
    """Return (tm, padded_M).  Small problems use one full-M tile (block ==
    full array dim is always legal); large ones use 512-row tiles + padding."""
    if M <= _ROW_TILE_TARGET:
        return M, M
    tm = _ROW_TILE_TARGET
    return tm, _round_up(M, tm)


def _pad_rows(a, m_padded):
    m = a.shape[0]
    if m == m_padded:
        return a
    return jnp.pad(a, ((0, m_padded - m), (0, 0)))


# ----------------------------------------------------------------------------
# Pallas kernels
# ----------------------------------------------------------------------------

def _add_ln_kernel(x_ref, y_ref, g_ref, b_ref, o_ref, *, eps):
    # (x + y) then LayerNorm over the last dim (f32 math).  Used for the
    # word+position embedding LayerNorm.
    h = x_ref[...].astype(jnp.float32) + y_ref[...].astype(jnp.float32)
    mu = jnp.mean(h, axis=-1, keepdims=True)
    var = jnp.mean(jnp.square(h - mu), axis=-1, keepdims=True)
    norm = (h - mu) * jax.lax.rsqrt(var + eps)
    o_ref[...] = (norm * g_ref[...] + b_ref[...]).astype(o_ref.dtype)


def add_layernorm_call(x, y, gamma, beta, out_dtype, eps=1e-12):
    M, D = x.shape
    tm, Mp = _row_tiling(M)
    out = pl.pallas_call(
        functools.partial(_add_ln_kernel, eps=eps),
        out_shape=jax.ShapeDtypeStruct((Mp, D), out_dtype),
        grid=(Mp // tm,),
        in_specs=[
            pl.BlockSpec((tm, D), lambda i: (i, 0)),
            pl.BlockSpec((tm, D), lambda i: (i, 0)),
            _const_spec((1, D)),
            _const_spec((1, D)),
        ],
        out_specs=pl.BlockSpec((tm, D), lambda i: (i, 0)),
        compiler_params=_cp(1),
    )(_pad_rows(x, Mp), _pad_rows(y, Mp), gamma, beta)
    return out[:M]


def _linear_res_ln_kernel(x_ref, w_ref, b_ref, res_ref, g_ref, beta_ref,
                          o_ref, *, eps):
    # Fused: y = x @ w + b; h = y + residual; LayerNorm(h) (f32 math).
    y = jnp.dot(x_ref[...], w_ref[...], preferred_element_type=jnp.float32)
    y = y + b_ref[...]
    h = y + res_ref[...].astype(jnp.float32)
    mu = jnp.mean(h, axis=-1, keepdims=True)
    var = jnp.mean(jnp.square(h - mu), axis=-1, keepdims=True)
    norm = (h - mu) * jax.lax.rsqrt(var + eps)
    o_ref[...] = (norm * g_ref[...] + beta_ref[...]).astype(o_ref.dtype)


def linear_res_ln_call(x, w, b, residual, gamma, beta, eps=1e-12):
    M, Din = x.shape
    Dout = w.shape[1]
    tm, Mp = _row_tiling(M)
    out = pl.pallas_call(
        functools.partial(_linear_res_ln_kernel, eps=eps),
        out_shape=jax.ShapeDtypeStruct((Mp, Dout), x.dtype),
        grid=(Mp // tm,),
        in_specs=[
            pl.BlockSpec((tm, Din), lambda i: (i, 0)),
            _const_spec((Din, Dout)),
            _const_spec((1, Dout)),
            pl.BlockSpec((tm, Dout), lambda i: (i, 0)),
            _const_spec((1, Dout)),
            _const_spec((1, Dout)),
        ],
        out_specs=pl.BlockSpec((tm, Dout), lambda i: (i, 0)),
        compiler_params=_cp(1),
    )(_pad_rows(x, Mp), w, b, _pad_rows(residual, Mp), gamma, beta)
    return out[:M]


def _ffn_fused_kernel(x_ref, w1_ref, b1_ref, w2_ref, b2_ref, g_ref, beta_ref,
                      o_ref, *, eps):
    # Fused FFN: h = gelu(x @ w1 + b1); y = h @ w2 + b2; LN(y + x).
    # The [tm, FFN] intermediate stays in VMEM (never round-trips to HBM).
    x = x_ref[...]                                               # [tm, D] bf16
    h = jnp.dot(x, w1_ref[...], preferred_element_type=jnp.float32)
    h = h + b1_ref[...]
    h = jax.nn.gelu(h, approximate=False)        # exact erf GELU (HF parity)
    y = jnp.dot(h.astype(x.dtype), w2_ref[...],
                preferred_element_type=jnp.float32)
    y = y + b2_ref[...]
    r = y + x.astype(jnp.float32)                                # residual
    mu = jnp.mean(r, axis=-1, keepdims=True)
    var = jnp.mean(jnp.square(r - mu), axis=-1, keepdims=True)
    norm = (r - mu) * jax.lax.rsqrt(var + eps)
    o_ref[...] = (norm * g_ref[...] + beta_ref[...]).astype(o_ref.dtype)


def ffn_call(x, w1, b1, w2, b2, gamma, beta, eps=1e-12):
    M, D = x.shape
    FFN = w1.shape[1]
    tm, Mp = _row_tiling(M)
    out = pl.pallas_call(
        functools.partial(_ffn_fused_kernel, eps=eps),
        out_shape=jax.ShapeDtypeStruct((Mp, D), x.dtype),
        grid=(Mp // tm,),
        in_specs=[
            pl.BlockSpec((tm, D), lambda i: (i, 0)),
            _const_spec((D, FFN)),
            _const_spec((1, FFN)),
            _const_spec((FFN, D)),
            _const_spec((1, D)),
            _const_spec((1, D)),
            _const_spec((1, D)),
        ],
        out_specs=pl.BlockSpec((tm, D), lambda i: (i, 0)),
        compiler_params=_cp(1),
    )(_pad_rows(x, Mp), w1, b1, w2, b2, gamma, beta)
    return out[:M]


def _attn_fused_kernel(x_ref, w_ref, b_ref, m_ref, o_ref, *,
                       n_heads, scale, tq):
    # One batch per grid step.  x: [S, D] bf16; w: [D, 3D] bf16 (q|k|v);
    # b: [1, 3D] f32; m: [1, S] additive mask bias.
    S, D = x_ref.shape
    Dh = D // n_heads
    x = x_ref[...]
    b = b_ref[...]

    # QKV projection computed in VMEM, one D-wide column chunk at a time
    # (keeps the live f32 accumulator at [S, D] instead of [S, 3D]); Q/K/V
    # never touch HBM.  The 1/sqrt(Dh) scale is folded into Q once.
    q = jnp.dot(x, w_ref[:, :D], preferred_element_type=jnp.float32)
    q = ((q + b[:, :D]) * scale).astype(x.dtype)
    k = jnp.dot(x, w_ref[:, D:2 * D], preferred_element_type=jnp.float32)
    k = (k + b[:, D:2 * D]).astype(x.dtype)
    v = jnp.dot(x, w_ref[:, 2 * D:], preferred_element_type=jnp.float32)
    v = (v + b[:, 2 * D:]).astype(x.dtype)
    mask = m_ref[...]                                            # [1, S] f32

    # Query tiling keeps the live score matrix at [tq, S] f32; per-head
    # contexts are concatenated and stored as one lane-dense [tq, D] slab
    # (no sub-128-lane masked stores, no XLA-side head transposes).
    for qi in range(S // tq):
        qs = slice(qi * tq, (qi + 1) * tq)
        ctxs = []
        for h in range(n_heads):
            hs = slice(h * Dh, (h + 1) * Dh)
            scores = jax.lax.dot_general(
                q[qs, hs], k[:, hs], (((1,), (1,)), ((), ())),
                preferred_element_type=jnp.float32)              # [tq, S]
            scores = scores + mask
            scores = scores - jnp.max(scores, axis=-1, keepdims=True)
            p = jnp.exp(scores)
            denom = jnp.sum(p, axis=-1, keepdims=True)
            p = p * pl.reciprocal(denom, approx=True)            # EUP recip
            ctxs.append(jnp.dot(p.astype(v.dtype), v[:, hs],
                                preferred_element_type=jnp.float32))
        o_ref[qs, :] = jnp.concatenate(ctxs, axis=-1).astype(o_ref.dtype)
    # TODO(synk): for S >= 1024 switch to a KV-tiled online-softmax (flash)
    # loop; for B=1 inference add a head-group grid axis so v7x's second
    # TensorCore gets work.


def fused_attention_call(x_bsd, wqkv, bqkv, mask_bias, n_heads, scale):
    # x: [B, S, D] bf16; mask_bias: [B, 1, S] f32.
    B, S, D = x_bsd.shape
    tq = S if S <= 256 else (128 if S % 128 == 0 else S)
    return pl.pallas_call(
        functools.partial(_attn_fused_kernel, n_heads=n_heads, scale=scale,
                          tq=tq),
        out_shape=jax.ShapeDtypeStruct((B, S, D), x_bsd.dtype),
        grid=(B,),
        in_specs=[
            pl.BlockSpec((None, S, D), lambda b: (b, 0, 0)),
            _const_spec((D, 3 * D)),
            _const_spec((1, 3 * D)),
            pl.BlockSpec((None, 1, S), lambda b: (b, 0, 0)),
        ],
        out_specs=pl.BlockSpec((None, S, D), lambda b: (b, 0, 0)),
        compiler_params=_cp(1),
    )(x_bsd, wqkv, bqkv, mask_bias)


# ----------------------------------------------------------------------------
# DistilBERT encoder built from the kernels above
# ----------------------------------------------------------------------------

def transformer_block(p, x, mask_bias, B, S, n_heads):
    M, D = x.shape
    Dh = D // n_heads

    # Fused QKV projection + multi-head attention (Q/K/V live only in VMEM).
    ctx = fused_attention_call(x.reshape(B, S, D), p["qkv_w"], p["qkv_b"],
                               mask_bias, n_heads, 1.0 / math.sqrt(Dh))
    ctx = ctx.reshape(M, D)

    # Output projection with residual-add + LayerNorm fused in the epilogue.
    x = linear_res_ln_call(ctx, p["o_w"], p["o_b"], x,
                           p["sa_ln_g"], p["sa_ln_b"])

    # Fused FFN: up-proj + GELU + down-proj + residual + LayerNorm,
    # one pallas_call, [tm, FFN] intermediate never leaves VMEM.
    x = ffn_call(x, p["ffn_w1"], p["ffn_b1"], p["ffn_w2"], p["ffn_b2"],
                 p["out_ln_g"], p["out_ln_b"])
    return x


def distilbert_layer_forward(params, input_ids, attention_mask, n_heads):
    """Mirrors DistilBertLayer.forward: returns (last_hidden_state, None)."""
    B, S = input_ids.shape
    D = params["word_emb"].shape[1]

    # Embedding gather (glue; no clean tiled Pallas gather at this scale).
    # Tables are stored bf16 to halve gather HBM bytes (f32 math in the LN).
    word = jnp.take(params["word_emb"], input_ids, axis=0)          # [B,S,D]
    pos = jnp.take(params["pos_emb"], jnp.arange(S), axis=0)        # [S,D]
    pos = jnp.broadcast_to(pos[None, :, :], (B, S, D))

    # Embedding LayerNorm -> bf16 activations for the encoder stack.
    x = add_layernorm_call(word.reshape(B * S, D), pos.reshape(B * S, D),
                           params["emb_ln_g"], params["emb_ln_b"],
                           out_dtype=jnp.bfloat16)

    # Additive mask bias: 0 where attended, -1e9 where padded.
    # TODO(synk): HF uses masked_fill(-inf); -1e9 additive bias matches to
    # ~1e-3 at bf16 inference precision.
    mask_bias = (1.0 - attention_mask.astype(jnp.float32)) * -1e9   # [B,S]
    mask_bias = mask_bias[:, None, :]                               # [B,1,S]

    for layer in params["layers"]:
        x = transformer_block(layer, x, mask_bias, B, S, n_heads)

    hidden_states = x.reshape(B, S, D).astype(jnp.float32)
    mask = None  # module returns (outputs, None)
    return hidden_states, mask


# ----------------------------------------------------------------------------
# Deterministic synthetic parameters (scaled-down DistilBERT config)
# ----------------------------------------------------------------------------

def init_params(key, vocab, max_pos, D, ffn, n_layers):
    keys = jax.random.split(key, 2 + n_layers)

    def dense(k, din, dout):
        # bf16 weights: MXU-peak operand dtype and half the weight DMA bytes.
        return (jax.random.normal(k, (din, dout)) * 0.02).astype(jnp.bfloat16)

    params = {
        "word_emb": (jax.random.normal(keys[0], (vocab, D)) * 0.02
                     ).astype(jnp.bfloat16),
        "pos_emb": (jax.random.normal(keys[1], (max_pos, D)) * 0.02
                    ).astype(jnp.bfloat16),
        "emb_ln_g": jnp.ones((1, D), jnp.float32),
        "emb_ln_b": jnp.zeros((1, D), jnp.float32),
        "layers": [],
    }
    for li in range(n_layers):
        lk = jax.random.split(keys[2 + li], 6)
        # Fused QKV weight: [D, 3D] (q | k | v along the output axis).
        qkv_w = jnp.concatenate([dense(lk[0], D, D),
                                 dense(lk[1], D, D),
                                 dense(lk[2], D, D)], axis=1)
        params["layers"].append({
            "qkv_w": qkv_w,
            "qkv_b": jnp.zeros((1, 3 * D), jnp.float32),
            "o_w": dense(lk[3], D, D),
            "o_b": jnp.zeros((1, D), jnp.float32),
            "sa_ln_g": jnp.ones((1, D), jnp.float32),
            "sa_ln_b": jnp.zeros((1, D), jnp.float32),
            "ffn_w1": dense(lk[4], D, ffn),
            "ffn_b1": jnp.zeros((1, ffn), jnp.float32),
            "ffn_w2": dense(lk[5], ffn, D),
            "ffn_b2": jnp.zeros((1, D), jnp.float32),
            "out_ln_g": jnp.ones((1, D), jnp.float32),
            "out_ln_b": jnp.zeros((1, D), jnp.float32),
        })
    return params


if __name__ == "__main__":
    # Small shapes consistent with the module's semantics (real model: D=768,
    # H=12, FFN=3072, 6 layers; here a scaled-down synthetic config).
    B, S = 2, 8
    VOCAB, MAX_POS, D, H, FFN, N_LAYERS = 100, 32, 64, 4, 128, 2

    key = jax.random.PRNGKey(0)
    pkey, ikey = jax.random.split(key)
    params = init_params(pkey, VOCAB, MAX_POS, D, FFN, N_LAYERS)

    # Pre-tokenized inputs (the string tokenizer is untranslatable to Pallas).
    input_ids = jax.random.randint(ikey, (B, S), 0, VOCAB, dtype=jnp.int32)
    attention_mask = jnp.ones((B, S), jnp.int32).at[1, 6:].set(0)  # padding

    outputs, mask = distilbert_layer_forward(params, input_ids,
                                             attention_mask, n_heads=H)
    jax.block_until_ready(outputs)

    assert outputs.shape == (B, S, D)
    assert outputs.dtype == jnp.float32
    assert mask is None
    assert bool(jnp.all(jnp.isfinite(outputs)))
    print("KERNEL_OK")
</pallas_src>

<mosaic_0001>
module attributes {stable_mosaic.version = 11 : i64} {
  func.func @_add_ln_kernel(%arg0: i32, %arg1: memref<16x64xbf16, #tpu.memory_space<vmem>>, %arg2: memref<16x64xbf16, #tpu.memory_space<vmem>>, %arg3: memref<1x64xf32, #tpu.memory_space<vmem>>, %arg4: memref<1x64xf32, #tpu.memory_space<vmem>>, %arg5: memref<16x64xbf16, #tpu.memory_space<vmem>>) attributes {dimension_semantics = [#tpu.dimension_semantics<parallel>], iteration_bounds = array<i64: 1>, scalar_prefetch = 0 : i64, scratch_operands = 0 : i64, tpu.core_type = #tpu.core_type<tc>, window_params = [{transform_indices = @transform_0, window_bounds = array<i64: 16, 64>}, {transform_indices = @transform_1, window_bounds = array<i64: 16, 64>}, {pipeline_mode = #tpu.pipeline_mode<synchronous>, transform_indices = @transform_2, window_bounds = array<i64: 1, 64>}, {pipeline_mode = #tpu.pipeline_mode<synchronous>, transform_indices = @transform_3, window_bounds = array<i64: 1, 64>}, {transform_indices = @transform_4, window_bounds = array<i64: 16, 64>}]} {
    %c0 = arith.constant 0 : index
    %c0_0 = arith.constant 0 : index
    %0 = vector.load %arg1[%c0, %c0_0] : memref<16x64xbf16, #tpu.memory_space<vmem>>, vector<16x64xbf16>
    %1 = arith.extf %0 : vector<16x64xbf16> to vector<16x64xf32>
    %c0_1 = arith.constant 0 : index
    %c0_2 = arith.constant 0 : index
    %2 = vector.load %arg2[%c0_1, %c0_2] : memref<16x64xbf16, #tpu.memory_space<vmem>>, vector<16x64xbf16>
    %3 = arith.extf %2 : vector<16x64xbf16> to vector<16x64xf32>
    %4 = arith.addf %1, %3 : vector<16x64xf32>
    %cst = arith.constant dense<0.000000e+00> : vector<16xf32>
    %5 = vector.multi_reduction <add>, %4, %cst [1] : vector<16x64xf32> to vector<16xf32>
    %6 = vector.shape_cast %5 : vector<16xf32> to vector<16x1xf32>
    %cst_3 = arith.constant 6.400000e+01 : f32
    %7 = vector.broadcast %cst_3 : f32 to vector<16x1xf32>
    %8 = arith.divf %6, %7 : vector<16x1xf32>
    %9 = vector.broadcast %8 : vector<16x1xf32> to vector<16x64xf32>
    %10 = arith.subf %4, %9 : vector<16x64xf32>
    %11 = arith.mulf %10, %10 : vector<16x64xf32>
    %cst_4 = arith.constant dense<0.000000e+00> : vector<16xf32>
    %12 = vector.multi_reduction <add>, %11, %cst_4 [1] : vector<16x64xf32> to vector<16xf32>
    %13 = vector.shape_cast %12 : vector<16xf32> to vector<16x1xf32>
    %cst_5 = arith.constant 6.400000e+01 : f32
    %14 = vector.broadcast %cst_5 : f32 to vector<16x1xf32>
    %15 = arith.divf %13, %14 : vector<16x1xf32>
    %16 = vector.broadcast %8 : vector<16x1xf32> to vector<16x64xf32>
    %17 = arith.subf %4, %16 : vector<16x64xf32>
    %cst_6 = arith.constant 9.99999996E-13 : f32
    %18 = vector.broadcast %cst_6 : f32 to vector<16x1xf32>
    %19 = arith.addf %15, %18 : vector<16x1xf32>
    %20 = math.rsqrt %19 : vector<16x1xf32>
    %21 = vector.broadcast %20 : vector<16x1xf32> to vector<16x64xf32>
    %22 = arith.mulf %17, %21 : vector<16x64xf32>
    %c0_7 = arith.constant 0 : index
    %c0_8 = arith.constant 0 : index
    %23 = vector.load %arg3[%c0_7, %c0_8] : memref<1x64xf32, #tpu.memory_space<vmem>>, vector<1x64xf32>
    %24 = vector.broadcast %23 : vector<1x64xf32> to vector<16x64xf32>
    %25 = arith.mulf %22, %24 : vector<16x64xf32>
    %c0_9 = arith.constant 0 : index
    %c0_10 = arith.constant 0 : index
    %26 = vector.load %arg4[%c0_9, %c0_10] : memref<1x64xf32, #tpu.memory_space<vmem>>, vector<1x64xf32>
    %27 = vector.broadcast %26 : vector<1x64xf32> to vector<16x64xf32>
    %28 = arith.addf %25, %27 : vector<16x64xf32>
    %29 = arith.truncf %28 : vector<16x64xf32> to vector<16x64xbf16>
    %c0_11 = arith.constant 0 : index
    %c0_12 = arith.constant 0 : index
    %30 = vector.load %arg5[%c0_11, %c0_12] : memref<16x64xbf16, #tpu.memory_space<vmem>>, vector<16x64xbf16>
    tpu.vector_store %arg5[%c0_11, %c0_12], %29 {strides = array<i32>} : memref<16x64xbf16, #tpu.memory_space<vmem>>, vector<16x64xbf16>,
    return
  }
  func.func @transform_0(%arg0: i32) -> (i32, i32) {
    %c0_i32 = arith.constant 0 : i32
    %c0_i32_0 = arith.constant 0 : i32
    return %arg0, %c0_i32 : i32, i32
  }
  func.func @transform_1(%arg0: i32) -> (i32, i32) {
    %c0_i32 = arith.constant 0 : i32
    %c0_i32_0 = arith.constant 0 : i32
    return %arg0, %c0_i32 : i32, i32
  }
  func.func @transform_2(%arg0: i32) -> (i32, i32) {
    %c0_i32 = arith.constant 0 : i32
    %c0_i32_0 = arith.constant 0 : i32
    %c0_i32_1 = arith.constant 0 : i32
    return %c0_i32, %c0_i32_0 : i32, i32
  }
  func.func @transform_3(%arg0: i32) -> (i32, i32) {
    %c0_i32 = arith.constant 0 : i32
    %c0_i32_0 = arith.constant 0 : i32
    %c0_i32_1 = arith.constant 0 : i32
    return %c0_i32, %c0_i32_0 : i32, i32
  }
  func.func @transform_4(%arg0: i32) -> (i32, i32) {
    %c0_i32 = arith.constant 0 : i32
    %c0_i32_0 = arith.constant 0 : i32
    return %arg0, %c0_i32 : i32, i32
  }
}

</mosaic_0001>

<bundles_post_ra>
// kernel: tpu_custom_call.1
= control target key start
LH: loop header
LB: loop body
LE: loop exit
PB: predicated region body
PF: predicated region fallthrough
CT: control target
= control target key end

     0   :  { %9 = vsyncpa [#allocation3], 0  ;;  %s311_s0 = inlined_call_operand.hbm [shape: bf16[16,64], index: 0, kind: input, shape index: {}]   ;;  %s312_s1 = inlined_call_operand.hbm [shape: bf16[16,64], index: 1, kind: input, shape index: {}]   ;;  %s313_s2 = inlined_call_operand.vmem [shape: f32[1,64], index: 2, kind: input, shape index: {}]   ;;  %s314_s3 = inlined_call_operand.vmem [shape: f32[1,64], index: 3, kind: input, shape index: {}]   ;;  %s315_s4 = inlined_call_operand.hbm [shape: bf16[16,64], index: 4, kind: output, shape index: {}]  }
   0x1   :  { %10 = vsyncpa [#allocation6], 0 }
   0x2   :  { %11 = vsyncpa [#allocation4], 0  ;;  %s226_s15 = smov [#allocation2]   ;;  %s154_s19 = scalar_lea.hbm %s311_s0, 128 }
   0x3   :  { %s17_s16 = sshll.u32 %s226_s15, 4  ;;  %p155_p0 = scmp.ne.s32.totalorder %s311_s0, %s154_s19  ;;  %s18_s16 = int_to_ptr.vmem [resolvable:$true] %s17_s16 }
   0x4   :  { %p158_p1 = scmp.lt.u32.totalorder %s154_s19, %s311_s0 }
   0x6   :  { %p160_p2 = pnand %p158_p1, %p155_p0 }
   0x8   :  { %163 = shalt.err (!%p160_p2)
}
   0x9   :  { %s164_s24 = scalar_lea.vmem %s18_s16, 128  ;;  %p169_p4 = scmp.lt.s32.totalorder %s18_s16, %s18_s16 }
   0xa   :  { %p165_p3 = scmp.ne.s32.totalorder %s18_s16, %s164_s24  ;;  %p170_p5 = scmp.lt.s32.totalorder %s164_s24, %s164_s24 }
   0xc   :  { %p171_p6 = por %p170_p5, %p169_p4 }
   0xe   :  { %p172_p7 = pnand %p171_p6, %p165_p3 }
  0x10   :  { %175 = shalt.err (!%p172_p7)
}
  0x11   :  { %s227_s25 = smov 64   ;;  %s228_s26 = smov 4  }
  0x12   :  { %23 = dma.hbm_to_vmem [thread:$0]  %s311_s0, 128, %s18_s16, [#allocation3], %s227_s25, %s227_s25, %s228_s26  }
  0x13   :  { %s229_s29 = smov [#allocation5]   ;;  %s176_s7 = scalar_lea.hbm %s312_s1, 128 }
  0x14   :  { %s29_s30 = sshll.u32 %s229_s29, 4  ;;  %p177_p8 = scmp.ne.s32.totalorder %s312_s1, %s176_s7  ;;  %s30_s30 = int_to_ptr.vmem [resolvable:$true] %s29_s30 }
  0x15   :  { %p180_p9 = scmp.lt.u32.totalorder %s176_s7, %s312_s1 }
  0x17   :  { %p182_p10 = pnand %p180_p9, %p177_p8 }
  0x19   :  { %185 = shalt.err (!%p182_p10)
}
  0x1a   :  { %s186_s12 = scalar_lea.vmem %s30_s30, 128  ;;  %p191_p12 = scmp.lt.s32.totalorder %s30_s30, %s30_s30 }
  0x1b   :  { %p187_p11 = scmp.ne.s32.totalorder %s30_s30, %s186_s12  ;;  %p192_p13 = scmp.lt.s32.totalorder %s186_s12, %s186_s12 }
  0x1d   :  { %p193_p0 = por %p192_p13, %p191_p12 }
  0x1f   :  { %p194_p1 = pnand %p193_p0, %p187_p11 }
  0x21   :  { %197 = shalt.err (!%p194_p1)
}
  0x22   :  { %35 = dma.hbm_to_vmem [thread:$0]  %s312_s1, 128, %s30_s30, [#allocation6], %s227_s25, %s227_s25, %s228_s26  }
  0x23   :  { %220 = dma.done.wait [#allocation3], 128  }
  0x24   :  { %221 = vsyncadd [#allocation3], 4294967168 }
  0x25   :  { %222 = dma.done.wait [#allocation6], 128  }
  0x26   :  { %223 = vsyncadd [#allocation6], 4294967168  ;;  %v138_v0 = vld [vmem:[#allocation2] sm:$0xff]   ;;  %v142_v1 = vld [vmem:[#allocation5] sm:$0xff]   ;;  %vm56_vm0 = vcmask 523264   ;;  %vm110_vm1 = vcmask 519168  }
  0x27   :  { %v139_v2 = vunpack.c.l.bf16 %v138_v0  ;;  %v143_v3 = vunpack.c.l.bf16 %v142_v1  ;;  %v140_v4 = vunpack.c.h.bf16 %v138_v0  ;;  %v144_v5 = vunpack.c.h.bf16 %v142_v1  ;;  %v131_v27 = vld [vmem:[%s313_s2] ss:$0 sm:$0xff]  ;;  %s230_s17 = smov [#allocation7]  }
  0x28   :  { %v132_v29 = vld [vmem:[%s314_s3] ss:$0 sm:$0xff]  ;;  %s118_s18 = sshll.u32 %s230_s17, 4  ;;  %s119_s18 = int_to_ptr.vmem [resolvable:$true] %s118_s18 }
  0x29   :  { %v54_v6 = vadd.f32 %v143_v3, %v139_v2  ;;  %v55_v7 = vadd.f32 %v144_v5, %v140_v4  ;;  %s198_s2 = scalar_lea.vmem %s119_s18, 128  ;;  %p203_p3 = scmp.lt.s32.totalorder %s119_s18, %s119_s18 }
  0x2a   :  { %p199_p2 = scmp.ne.s32.totalorder %s119_s18, %s198_s2  ;;  %p204_p4 = scmp.lt.s32.totalorder %s198_s2, %s198_s2 }
  0x2b   :  { %v57_v8 = vsel %vm56_vm0, %v54_v6, 0.0  ;;  %v60_v9 = vsel %vm56_vm0, %v55_v7, 0.0 }
  0x2c   :  { %58 = vadd.xlane.f32.xlu0 %v57_v8  ;;  %p205_p5 = por %p204_p4, %p203_p3 }
  0x2e   :  { %p206_p6 = pnand %p205_p5, %p199_p2 }
  0x30   :  { %61 = vadd.xlane.f32.xlu0 %v60_v9 }
  0xb9   :  { %v59_v10 = vpop.xlane.xlu0 %58 }
  0xba   :  { %v64_v11 = vmul.f32 0.015625, %v59_v10 }
  0xbc   :  { %v66_v12 = vsub.f32 %v54_v6, %v64_v11 }
  0xbd   :  { %v62_v13 = vpop.xlane.xlu0 %61 }
  0xbe   :  { %v65_v14 = vmul.f32 0.015625, %v62_v13  ;;  %v68_v15 = vmul.f32 %v66_v12, %v66_v12 }
  0xc0   :  { %v67_v16 = vsub.f32 %v55_v7, %v65_v14  ;;  %v70_v17 = vsel %vm56_vm0, %v68_v15, 0.0 }
  0xc1   :  { %71 = vadd.xlane.f32.xlu1 %v70_v17 }
  0xc2   :  { %v69_v18 = vmul.f32 %v67_v16, %v67_v16 }
  0xc4   :  { %v73_v19 = vsel %vm56_vm0, %v69_v18, 0.0 }
  0xc5   :  { %74 = vadd.xlane.f32.xlu1 %v73_v19 }
 0x14e   :  { %v72_v20 = vpop.xlane.xlu1 %71 }
 0x14f   :  { %v76_v21 = vmul.f32 0.015625, %v72_v20 }
 0x151   :  { %v78_v22 = vadd.f32 1e-12, %v76_v21 }
 0x152   :  { %v75_v23 = vpop.xlane.xlu1 %74 }
 0x153   :  { %150 = vrsqrt.f32 %v78_v22  ;;  %v77_v24 = vmul.f32 0.015625, %v75_v23 }
 0x155   :  { %v79_v25 = vadd.f32 1e-12, %v77_v24 }
 0x157   :  { %152 = vrsqrt.f32 %v79_v25 }
 0x15d   :  { %v151_v26 = vpop.eup %150 }
 0x15e   :  { %v82_v28 = vmul.f32 %v151_v26, %v66_v12 }
 0x160   :  { %v91_v30 = vmul.f32 %v131_v27, %v82_v28 }
 0x161   :  { %v153_v31 = vpop.eup %152 }
 0x162   :  { %v83_v32 = vmul.f32 %v153_v31, %v67_v16  ;;  %v100_v33 = vadd.f32 %v132_v29, %v91_v30 }
 0x164   :  { %v92_v34 = vmul.f32 %v131_v27, %v83_v32  ;;  %v135_v35 = vpack.c.bf16 %v100_v33, %v100_v33 }
 0x166   :  { %v101_v36 = vadd.f32 %v132_v29, %v92_v34  ;;  %111 = vst.msk [vmem:[#allocation7] sm:$0xf] %vm110_vm1, %v135_v35 }
 0x168   :  { %v136_v37 = vpack.c.bf16 %v101_v36, %v101_v36 }
 0x16a   :  { %112 = vst.msk [vmem:[#allocation7 + $0x4] sm:$0xf] %vm110_vm1, %v136_v37 }
 0x16b   :  { %209 = shalt.err (!%p206_p6)
}
 0x16c   :  { %s210_s20 = scalar_lea.hbm %s315_s4, 128 }
 0x16d   :  { %p211_p7 = scmp.ne.s32.totalorder %s315_s4, %s210_s20  ;;  %p214_p8 = scmp.lt.u32.totalorder %s210_s20, %s315_s4 }
 0x16f   :  { %p216_p9 = pnand %p214_p8, %p211_p7 }
 0x171   :  { %219 = shalt.err (!%p216_p9)
}
 0x172   :  { %124 = dma.vmem_to_hbm [thread:$0]  %s119_s18, 128, %s315_s4, [#allocation4], %s227_s25, %s227_s25, %s228_s26  }
 0x173   :  { %224 = dma.done.wait [#allocation4], 128  }
 0x174   :  { %225 = vsyncadd [#allocation4], 4294967168 }
 0x175   :  { %128 = vsyncpa [#allocation3], 1 }
 0x176   :  { %129 = vsyncpa [#allocation6], 1 }
 0x177   :  { %130 = vsyncpa [#allocation4], 1 }

</bundles_post_ra>
